<compile_context>
chip_gen: v7x
topology: tpu7x:2x2x1
jax: 0.10.0
libtpu: 0.0.40
codegen_flags: <defaults>
</compile_context>

<pallas_src>
import numpy as np
import jax
import jax.numpy as jnp
from jax.experimental import pallas as pl
from jax.experimental.pallas import tpu as pltpu

_PREC = jax.lax.Precision.HIGHEST


def _leaky_relu(v):
    return jnp.where(v >= 0, v, 0.2 * v)


def _round_up(x, m):
    return ((x + m - 1) // m) * m


def _resident(shape):
    # Full-array block, constant index map -> stays in VMEM for all grid steps.
    nd = len(shape)
    return pl.BlockSpec(shape, lambda i, _nd=nd: (0,) * _nd)


# ---------------------------------------------------------------------------
# Kernel: z-tile -> (frequencies-tile, phase_shifts-tile)
# ---------------------------------------------------------------------------
def mapping_kernel(z_ref, w1, b1, w2, b2, w3, b3, w4f, b4f, w4p, b4p,
                   freq_ref, phase_ref):
    h = _leaky_relu(jnp.dot(z_ref[...], w1[...],
                            preferred_element_type=jnp.float32, precision=_PREC) + b1[...])
    h = _leaky_relu(jnp.dot(h, w2[...],
                            preferred_element_type=jnp.float32, precision=_PREC) + b2[...])
    h = _leaky_relu(jnp.dot(h, w3[...],
                            preferred_element_type=jnp.float32, precision=_PREC) + b3[...])
    # Final layer split host-side into the two output halves -> lane-dense stores.
    freq_ref[...] = jnp.dot(h, w4f[...],
                            preferred_element_type=jnp.float32, precision=_PREC) + b4f[...]
    phase_ref[...] = jnp.dot(h, w4p[...],
                             preferred_element_type=jnp.float32, precision=_PREC) + b4p[...]


# ---------------------------------------------------------------------------
# Wrapper == CustomMappingNetwork.forward
# ---------------------------------------------------------------------------
def custom_mapping_network(z, params, tile_b=256):
    B, z_dim = z.shape
    out_dim = params["w4"].shape[1]
    half = out_dim // 2

    # Split the last layer so each output half is written directly (no in-kernel slice).
    w4f, w4p = params["w4"][:, :half], params["w4"][:, half:]
    b4f, b4p = params["b4"][:, :half], params["b4"][:, half:]

    tile_b = int(min(tile_b, _round_up(B, 8)))
    B_pad = _round_up(B, tile_b)
    z_p = z if B_pad == B else jnp.pad(z, ((0, B_pad - B), (0, 0)))

    weight_args = (params["w1"], params["b1"], params["w2"], params["b2"],
                   params["w3"], params["b3"], w4f, b4f, w4p, b4p)

    freq, phase = pl.pallas_call(
        mapping_kernel,
        out_shape=(jax.ShapeDtypeStruct((B_pad, half), jnp.float32),
                   jax.ShapeDtypeStruct((B_pad, half), jnp.float32)),
        grid_spec=pltpu.PrefetchScalarGridSpec(
            num_scalar_prefetch=0,
            grid=(B_pad // tile_b,),
            in_specs=[pl.BlockSpec((tile_b, z_dim), lambda i: (i, 0))]
                     + [_resident(a.shape) for a in weight_args],
            out_specs=[pl.BlockSpec((tile_b, half), lambda i: (i, 0)),
                       pl.BlockSpec((tile_b, half), lambda i: (i, 0))],
        ),
        compiler_params=pltpu.CompilerParams(
            dimension_semantics=("parallel",)),
    )(z_p, *weight_args)

    if B_pad != B:
        freq, phase = freq[:B], phase[:B]
    return freq, phase


# ---------------------------------------------------------------------------
# Deterministic parameter init mirroring the PyTorch __init__ distributions
# ---------------------------------------------------------------------------
def init_params(key, z_dim, map_hidden_dim, map_output_dim):
    keys = jax.random.split(key, 8)

    def kaiming_leaky(k, fan_in, fan_out):          # kaiming_normal_, a=0.2, fan_in
        std = np.sqrt(2.0 / (1.0 + 0.2 ** 2)) / np.sqrt(fan_in)
        return jax.random.normal(k, (fan_in, fan_out), jnp.float32) * std

    def default_bias(k, fan_in, fan_out):           # PyTorch Linear default bias
        bound = 1.0 / np.sqrt(fan_in)
        return jax.random.uniform(k, (1, fan_out), jnp.float32, -bound, bound)

    dims = [(z_dim, map_hidden_dim), (map_hidden_dim, map_hidden_dim),
            (map_hidden_dim, map_hidden_dim), (map_hidden_dim, map_output_dim)]
    p = {}
    for idx, (fi, fo) in enumerate(dims, start=1):
        w = kaiming_leaky(keys[2 * (idx - 1)], fi, fo)
        if idx == 4:
            w = w * 0.25                             # last mapping layer weight *= 0.25
        p[f"w{idx}"] = w
        p[f"b{idx}"] = default_bias(keys[2 * (idx - 1) + 1], fi, fo)
    return p


# ---------------------------------------------------------------------------
# Pure-JAX reference for validation
# ---------------------------------------------------------------------------
def reference_forward(z, params):
    h = z
    for i in (1, 2, 3):
        h = _leaky_relu(jnp.dot(h, params[f"w{i}"], precision=_PREC) + params[f"b{i}"])
    o = jnp.dot(h, params["w4"], precision=_PREC) + params["b4"]
    half = o.shape[-1] // 2
    return o[:, :half], o[:, half:]


if __name__ == "__main__":
    key = jax.random.PRNGKey(0)
    k_param, k_z1, k_z2, k_z3 = jax.random.split(key, 4)

    # Shapes consistent with the SIREN use of this module:
    #   z_dim=16, map_hidden_dim=32, map_output_dim=256 (= 4 FiLM layers * 32 hidden * 2)
    Z_DIM, HIDDEN, OUT_DIM = 16, 32, 256
    params = init_params(k_param, Z_DIM, HIDDEN, OUT_DIM)

    # Small spec-sized example (batch = 2).
    z = jax.random.normal(k_z1, (2, Z_DIM), jnp.float32)
    freq, phase = custom_mapping_network(z, params)
    jax.block_until_ready((freq, phase))
    assert freq.shape == (2, OUT_DIM // 2) and phase.shape == (2, OUT_DIM // 2)
    r_f, r_p = reference_forward(z, params)
    np.testing.assert_allclose(np.asarray(freq), np.asarray(r_f), rtol=1e-5, atol=1e-5)
    np.testing.assert_allclose(np.asarray(phase), np.asarray(r_p), rtol=1e-5, atol=1e-5)

    # Ragged batch (exercises the 8-aligned padding path).
    z13 = jax.random.normal(k_z2, (13, Z_DIM), jnp.float32)
    f13, p13 = custom_mapping_network(z13, params)
    jax.block_until_ready((f13, p13))
    r_f13, r_p13 = reference_forward(z13, params)
    np.testing.assert_allclose(np.asarray(f13), np.asarray(r_f13), rtol=1e-5, atol=1e-5)
    np.testing.assert_allclose(np.asarray(p13), np.asarray(r_p13), rtol=1e-5, atol=1e-5)

    # Larger batch (exercises the multi-tile "parallel" grid: 512 / 256 = 2 steps).
    z512 = jax.random.normal(k_z3, (512, Z_DIM), jnp.float32)
    f512, p512 = custom_mapping_network(z512, params)
    jax.block_until_ready((f512, p512))
    r_f512, r_p512 = reference_forward(z512, params)
    np.testing.assert_allclose(np.asarray(f512), np.asarray(r_f512), rtol=1e-5, atol=1e-5)
    np.testing.assert_allclose(np.asarray(p512), np.asarray(r_p512), rtol=1e-5, atol=1e-5)

    print("KERNEL_OK")
</pallas_src>

<mosaic_0001>
module attributes {stable_mosaic.version = 11 : i64} {
  func.func @mapping_kernel(%arg0: i32, %arg1: memref<8x16xf32, #tpu.memory_space<vmem>>, %arg2: memref<16x32xf32, #tpu.memory_space<vmem>>, %arg3: memref<1x32xf32, #tpu.memory_space<vmem>>, %arg4: memref<32x32xf32, #tpu.memory_space<vmem>>, %arg5: memref<1x32xf32, #tpu.memory_space<vmem>>, %arg6: memref<32x32xf32, #tpu.memory_space<vmem>>, %arg7: memref<1x32xf32, #tpu.memory_space<vmem>>, %arg8: memref<32x128xf32, #tpu.memory_space<vmem>>, %arg9: memref<1x128xf32, #tpu.memory_space<vmem>>, %arg10: memref<32x128xf32, #tpu.memory_space<vmem>>, %arg11: memref<1x128xf32, #tpu.memory_space<vmem>>, %arg12: memref<8x128xf32, #tpu.memory_space<vmem>>, %arg13: memref<8x128xf32, #tpu.memory_space<vmem>>) attributes {dimension_semantics = [#tpu.dimension_semantics<parallel>], iteration_bounds = array<i64: 1>, scalar_prefetch = 0 : i64, scratch_operands = 0 : i64, tpu.core_type = #tpu.core_type<tc>, window_params = [{transform_indices = @transform_0, window_bounds = array<i64: 8, 16>}, {pipeline_mode = #tpu.pipeline_mode<synchronous>, transform_indices = @transform_1, window_bounds = array<i64: 16, 32>}, {pipeline_mode = #tpu.pipeline_mode<synchronous>, transform_indices = @transform_2, window_bounds = array<i64: 1, 32>}, {pipeline_mode = #tpu.pipeline_mode<synchronous>, transform_indices = @transform_3, window_bounds = array<i64: 32, 32>}, {pipeline_mode = #tpu.pipeline_mode<synchronous>, transform_indices = @transform_4, window_bounds = array<i64: 1, 32>}, {pipeline_mode = #tpu.pipeline_mode<synchronous>, transform_indices = @transform_5, window_bounds = array<i64: 32, 32>}, {pipeline_mode = #tpu.pipeline_mode<synchronous>, transform_indices = @transform_6, window_bounds = array<i64: 1, 32>}, {pipeline_mode = #tpu.pipeline_mode<synchronous>, transform_indices = @transform_7, window_bounds = array<i64: 32, 128>}, {pipeline_mode = #tpu.pipeline_mode<synchronous>, transform_indices = @transform_8, window_bounds = array<i64: 1, 128>}, {pipeline_mode = #tpu.pipeline_mode<synchronous>, transform_indices = @transform_9, window_bounds = array<i64: 32, 128>}, {pipeline_mode = #tpu.pipeline_mode<synchronous>, transform_indices = @transform_10, window_bounds = array<i64: 1, 128>}, {transform_indices = @transform_11, window_bounds = array<i64: 8, 128>}, {transform_indices = @transform_12, window_bounds = array<i64: 8, 128>}]} {
    %c0 = arith.constant 0 : index
    %c0_0 = arith.constant 0 : index
    %0 = vector.load %arg1[%c0, %c0_0] : memref<8x16xf32, #tpu.memory_space<vmem>>, vector<8x16xf32>
    %c0_1 = arith.constant 0 : index
    %c0_2 = arith.constant 0 : index
    %1 = vector.load %arg2[%c0_1, %c0_2] : memref<16x32xf32, #tpu.memory_space<vmem>>, vector<16x32xf32>
    %cst = arith.constant dense<0.000000e+00> : vector<8x32xf32>
    %2 = tpu.matmul %0, %1, %cst {dimension_numbers = #tpu.dot_dimension_numbers<[1], [0], [0], [1], [0, 0, 1, 1], [], []>, precision = #tpu.contract_precision<fp32>} : vector<8x16xf32>, vector<16x32xf32>, vector<8x32xf32> -> vector<8x32xf32>
    %c0_3 = arith.constant 0 : index
    %c0_4 = arith.constant 0 : index
    %3 = vector.load %arg3[%c0_3, %c0_4] : memref<1x32xf32, #tpu.memory_space<vmem>>, vector<1x32xf32>
    %4 = vector.broadcast %3 : vector<1x32xf32> to vector<8x32xf32>
    %5 = arith.addf %2, %4 : vector<8x32xf32>
    %cst_5 = arith.constant 0.000000e+00 : f32
    %6 = vector.broadcast %cst_5 : f32 to vector<8x32xf32>
    %7 = arith.cmpf oge, %5, %6 : vector<8x32xf32>
    %cst_6 = arith.constant 2.000000e-01 : f32
    %8 = vector.broadcast %cst_6 : f32 to vector<8x32xf32>
    %9 = arith.mulf %8, %5 : vector<8x32xf32>
    %10 = arith.select %7, %5, %9 : vector<8x32xi1>, vector<8x32xf32>
    %c0_7 = arith.constant 0 : index
    %c0_8 = arith.constant 0 : index
    %11 = vector.load %arg4[%c0_7, %c0_8] : memref<32x32xf32, #tpu.memory_space<vmem>>, vector<32x32xf32>
    %cst_9 = arith.constant dense<0.000000e+00> : vector<8x32xf32>
    %12 = tpu.matmul %10, %11, %cst_9 {dimension_numbers = #tpu.dot_dimension_numbers<[1], [0], [0], [1], [0, 0, 1, 1], [], []>, precision = #tpu.contract_precision<fp32>} : vector<8x32xf32>, vector<32x32xf32>, vector<8x32xf32> -> vector<8x32xf32>
    %c0_10 = arith.constant 0 : index
    %c0_11 = arith.constant 0 : index
    %13 = vector.load %arg5[%c0_10, %c0_11] : memref<1x32xf32, #tpu.memory_space<vmem>>, vector<1x32xf32>
    %14 = vector.broadcast %13 : vector<1x32xf32> to vector<8x32xf32>
    %15 = arith.addf %12, %14 : vector<8x32xf32>
    %cst_12 = arith.constant 0.000000e+00 : f32
    %16 = vector.broadcast %cst_12 : f32 to vector<8x32xf32>
    %17 = arith.cmpf oge, %15, %16 : vector<8x32xf32>
    %cst_13 = arith.constant 2.000000e-01 : f32
    %18 = vector.broadcast %cst_13 : f32 to vector<8x32xf32>
    %19 = arith.mulf %18, %15 : vector<8x32xf32>
    %20 = arith.select %17, %15, %19 : vector<8x32xi1>, vector<8x32xf32>
    %c0_14 = arith.constant 0 : index
    %c0_15 = arith.constant 0 : index
    %21 = vector.load %arg6[%c0_14, %c0_15] : memref<32x32xf32, #tpu.memory_space<vmem>>, vector<32x32xf32>
    %cst_16 = arith.constant dense<0.000000e+00> : vector<8x32xf32>
    %22 = tpu.matmul %20, %21, %cst_16 {dimension_numbers = #tpu.dot_dimension_numbers<[1], [0], [0], [1], [0, 0, 1, 1], [], []>, precision = #tpu.contract_precision<fp32>} : vector<8x32xf32>, vector<32x32xf32>, vector<8x32xf32> -> vector<8x32xf32>
    %c0_17 = arith.constant 0 : index
    %c0_18 = arith.constant 0 : index
    %23 = vector.load %arg7[%c0_17, %c0_18] : memref<1x32xf32, #tpu.memory_space<vmem>>, vector<1x32xf32>
    %24 = vector.broadcast %23 : vector<1x32xf32> to vector<8x32xf32>
    %25 = arith.addf %22, %24 : vector<8x32xf32>
    %cst_19 = arith.constant 0.000000e+00 : f32
    %26 = vector.broadcast %cst_19 : f32 to vector<8x32xf32>
    %27 = arith.cmpf oge, %25, %26 : vector<8x32xf32>
    %cst_20 = arith.constant 2.000000e-01 : f32
    %28 = vector.broadcast %cst_20 : f32 to vector<8x32xf32>
    %29 = arith.mulf %28, %25 : vector<8x32xf32>
    %30 = arith.select %27, %25, %29 : vector<8x32xi1>, vector<8x32xf32>
    %c0_21 = arith.constant 0 : index
    %c0_22 = arith.constant 0 : index
    %31 = vector.load %arg8[%c0_21, %c0_22] : memref<32x128xf32, #tpu.memory_space<vmem>>, vector<32x128xf32>
    %cst_23 = arith.constant dense<0.000000e+00> : vector<8x128xf32>
    %32 = tpu.matmul %30, %31, %cst_23 {dimension_numbers = #tpu.dot_dimension_numbers<[1], [0], [0], [1], [0, 0, 1, 1], [], []>, precision = #tpu.contract_precision<fp32>} : vector<8x32xf32>, vector<32x128xf32>, vector<8x128xf32> -> vector<8x128xf32>
    %c0_24 = arith.constant 0 : index
    %c0_25 = arith.constant 0 : index
    %33 = vector.load %arg9[%c0_24, %c0_25] : memref<1x128xf32, #tpu.memory_space<vmem>>, vector<1x128xf32>
    %34 = vector.broadcast %33 : vector<1x128xf32> to vector<8x128xf32>
    %35 = arith.addf %32, %34 : vector<8x128xf32>
    %c0_26 = arith.constant 0 : index
    %c0_27 = arith.constant 0 : index
    %36 = vector.load %arg12[%c0_26, %c0_27] : memref<8x128xf32, #tpu.memory_space<vmem>>, vector<8x128xf32>
    tpu.vector_store %arg12[%c0_26, %c0_27], %35 {strides = array<i32>} : memref<8x128xf32, #tpu.memory_space<vmem>>, vector<8x128xf32>,
    %c0_28 = arith.constant 0 : index
    %c0_29 = arith.constant 0 : index
    %37 = vector.load %arg10[%c0_28, %c0_29] : memref<32x128xf32, #tpu.memory_space<vmem>>, vector<32x128xf32>
    %cst_30 = arith.constant dense<0.000000e+00> : vector<8x128xf32>
    %38 = tpu.matmul %30, %37, %cst_30 {dimension_numbers = #tpu.dot_dimension_numbers<[1], [0], [0], [1], [0, 0, 1, 1], [], []>, precision = #tpu.contract_precision<fp32>} : vector<8x32xf32>, vector<32x128xf32>, vector<8x128xf32> -> vector<8x128xf32>
    %c0_31 = arith.constant 0 : index
    %c0_32 = arith.constant 0 : index
    %39 = vector.load %arg11[%c0_31, %c0_32] : memref<1x128xf32, #tpu.memory_space<vmem>>, vector<1x128xf32>
    %40 = vector.broadcast %39 : vector<1x128xf32> to vector<8x128xf32>
    %41 = arith.addf %38, %40 : vector<8x128xf32>
    %c0_33 = arith.constant 0 : index
    %c0_34 = arith.constant 0 : index
    %42 = vector.load %arg13[%c0_33, %c0_34] : memref<8x128xf32, #tpu.memory_space<vmem>>, vector<8x128xf32>
    tpu.vector_store %arg13[%c0_33, %c0_34], %41 {strides = array<i32>} : memref<8x128xf32, #tpu.memory_space<vmem>>, vector<8x128xf32>,
    return
  }
  func.func @transform_0(%arg0: i32) -> (i32, i32) {
    %c0_i32 = arith.constant 0 : i32
    %c0_i32_0 = arith.constant 0 : i32
    return %arg0, %c0_i32 : i32, i32
  }
  func.func @transform_1(%arg0: i32) -> (i32, i32) {
    %c0_i32 = arith.constant 0 : i32
    %c0_i32_0 = arith.constant 0 : i32
    %c0_i32_1 = arith.constant 0 : i32
    return %c0_i32, %c0_i32_0 : i32, i32
  }
  func.func @transform_2(%arg0: i32) -> (i32, i32) {
    %c0_i32 = arith.constant 0 : i32
    %c0_i32_0 = arith.constant 0 : i32
    %c0_i32_1 = arith.constant 0 : i32
    return %c0_i32, %c0_i32_0 : i32, i32
  }
  func.func @transform_3(%arg0: i32) -> (i32, i32) {
    %c0_i32 = arith.constant 0 : i32
    %c0_i32_0 = arith.constant 0 : i32
    %c0_i32_1 = arith.constant 0 : i32
    return %c0_i32, %c0_i32_0 : i32, i32
  }
  func.func @transform_4(%arg0: i32) -> (i32, i32) {
    %c0_i32 = arith.constant 0 : i32
    %c0_i32_0 = arith.constant 0 : i32
    %c0_i32_1 = arith.constant 0 : i32
    return %c0_i32, %c0_i32_0 : i32, i32
  }
  func.func @transform_5(%arg0: i32) -> (i32, i32) {
    %c0_i32 = arith.constant 0 : i32
    %c0_i32_0 = arith.constant 0 : i32
    %c0_i32_1 = arith.constant 0 : i32
    return %c0_i32, %c0_i32_0 : i32, i32
  }
  func.func @transform_6(%arg0: i32) -> (i32, i32) {
    %c0_i32 = arith.constant 0 : i32
    %c0_i32_0 = arith.constant 0 : i32
    %c0_i32_1 = arith.constant 0 : i32
    return %c0_i32, %c0_i32_0 : i32, i32
  }
  func.func @transform_7(%arg0: i32) -> (i32, i32) {
    %c0_i32 = arith.constant 0 : i32
    %c0_i32_0 = arith.constant 0 : i32
    %c0_i32_1 = arith.constant 0 : i32
    return %c0_i32, %c0_i32_0 : i32, i32
  }
  func.func @transform_8(%arg0: i32) -> (i32, i32) {
    %c0_i32 = arith.constant 0 : i32
    %c0_i32_0 = arith.constant 0 : i32
    %c0_i32_1 = arith.constant 0 : i32
    return %c0_i32, %c0_i32_0 : i32, i32
  }
  func.func @transform_9(%arg0: i32) -> (i32, i32) {
    %c0_i32 = arith.constant 0 : i32
    %c0_i32_0 = arith.constant 0 : i32
    %c0_i32_1 = arith.constant 0 : i32
    return %c0_i32, %c0_i32_0 : i32, i32
  }
  func.func @transform_10(%arg0: i32) -> (i32, i32) {
    %c0_i32 = arith.constant 0 : i32
    %c0_i32_0 = arith.constant 0 : i32
    %c0_i32_1 = arith.constant 0 : i32
    return %c0_i32, %c0_i32_0 : i32, i32
  }
  func.func @transform_11(%arg0: i32) -> (i32, i32) {
    %c0_i32 = arith.constant 0 : i32
    %c0_i32_0 = arith.constant 0 : i32
    return %arg0, %c0_i32 : i32, i32
  }
  func.func @transform_12(%arg0: i32) -> (i32, i32) {
    %c0_i32 = arith.constant 0 : i32
    %c0_i32_0 = arith.constant 0 : i32
    return %arg0, %c0_i32 : i32, i32
  }
}

</mosaic_0001>

<bundles_post_ra>
// kernel: tpu_custom_call.1
= control target key start
LH: loop header
LB: loop body
LE: loop exit
PB: predicated region body
PF: predicated region fallthrough
CT: control target
= control target key end

     0   :  { %18 = vsyncpa [#allocation3], 0  ;;  %s3945_s0 = inlined_call_operand.hbm [shape: f32[8,16], index: 0, kind: input, shape index: {}]   ;;  %s3946_s1 = inlined_call_operand.hbm [shape: f32[16,32], index: 1, kind: input, shape index: {}]   ;;  %s3947_s2 = inlined_call_operand.vmem [shape: f32[1,32], index: 2, kind: input, shape index: {}]   ;;  %s3948_s3 = inlined_call_operand.hbm [shape: f32[32,32], index: 3, kind: input, shape index: {}]   ;;  %s3949_s4 = inlined_call_operand.vmem [shape: f32[1,32], index: 4, kind: input, shape index: {}]   ;;  %s3950_s5 = inlined_call_operand.hbm [shape: f32[32,32], index: 5, kind: input, shape index: {}]   ;;  %s3951_s6 = inlined_call_operand.hbm [shape: f32[1,32], index: 6, kind: input, shape index: {}]   ;;  %s3952_s7 = inlined_call_operand.hbm [shape: f32[32,128], index: 7, kind: input, shape index: {}]   ;;  %s3953_s8 = inlined_call_operand.hbm [shape: f32[1,128], index: 8, kind: input, shape index: {}]   ;;  %s3954_s9 = inlined_call_operand.vmem [shape: f32[32,128], index: 9, kind: input, shape index: {}]   ;;  %s3955_s10 = inlined_call_operand.vmem [shape: f32[1,128], index: 10, kind: input, shape index: {}]   ;;  %s3956_s11 = inlined_call_operand.hbm [shape: f32[8,128], index: 11, kind: output, shape index: {0}]   ;;  %s3957_s12 = inlined_call_operand.hbm [shape: f32[8,128], index: 12, kind: output, shape index: {1}]  }
   0x1   :  { %19 = vsyncpa [#allocation6], 0 }
   0x2   :  { %20 = vsyncpa [#allocation9], 0 }
   0x3   :  { %21 = vsyncpa [#allocation12], 0 }
   0x4   :  { %22 = vsyncpa [#allocation4], 0 }
   0x5   :  { %23 = vsyncpa [#allocation16], 0  ;;  %s3529_s21 = smov [#allocation5]   ;;  %s3319_s25 = scalar_lea.hbm %s3946_s1, 256 }
   0x6   :  { %s39_s22 = sshll.u32 %s3529_s21, 4  ;;  %p3320_p0 = scmp.ne.s32.totalorder %s3946_s1, %s3319_s25  ;;  %s40_s22 = int_to_ptr.vmem [resolvable:$true] %s39_s22 }
   0x7   :  { %p3323_p1 = scmp.lt.u32.totalorder %s3319_s25, %s3946_s1 }
   0x9   :  { %p3325_p2 = pnand %p3323_p1, %p3320_p0 }
   0xb   :  { %3328 = shalt.err (!%p3325_p2)
}
   0xc   :  { %s3329_s30 = scalar_lea.vmem %s40_s22, 256  ;;  %p3334_p4 = scmp.lt.s32.totalorder %s40_s22, %s40_s22 }
   0xd   :  { %p3330_p3 = scmp.ne.s32.totalorder %s40_s22, %s3329_s30  ;;  %p3335_p5 = scmp.lt.s32.totalorder %s3329_s30, %s3329_s30 }
   0xf   :  { %p3336_p6 = por %p3335_p5, %p3334_p4 }
  0x11   :  { %p3337_p7 = pnand %p3336_p6, %p3330_p3 }
  0x13   :  { %3340 = shalt.err (!%p3337_p7)
}
  0x14   :  { %s3530_s13 = smov 128   ;;  %s3531_s14 = smov 8  }
  0x15   :  { %45 = dma.hbm_to_vmem [thread:$0]  %s3946_s1, 256, %s40_s22, [#allocation6], %s3530_s13, %s3530_s13, %s3531_s14  }
  0x16   :  { %s3532_s17 = smov [#allocation8]   ;;  %s3533_s19 = smov [#allocation11]  }
  0x17   :  { %s67_s18 = sshll.u32 %s3532_s17, 4  ;;  %s89_s20 = sshll.u32 %s3533_s19, 4  ;;  %s68_s18 = int_to_ptr.vmem [resolvable:$true] %s67_s18  ;;  %s90_s20 = int_to_ptr.vmem [resolvable:$true] %s89_s20 }
  0x18   :  { %s3341_s24 = scalar_lea.hbm %s3950_s5, 512 }
  0x19   :  { %p3342_p8 = scmp.ne.s32.totalorder %s3950_s5, %s3341_s24  ;;  %p3345_p9 = scmp.lt.u32.totalorder %s3341_s24, %s3950_s5 }
  0x1b   :  { %p3347_p10 = pnand %p3345_p9, %p3342_p8 }
  0x1d   :  { %3350 = shalt.err (!%p3347_p10)
}
  0x1e   :  { %s3351_s1 = scalar_lea.vmem %s68_s18, 512  ;;  %p3356_p12 = scmp.lt.s32.totalorder %s68_s18, %s68_s18 }
  0x1f   :  { %p3352_p11 = scmp.ne.s32.totalorder %s68_s18, %s3351_s1  ;;  %p3357_p13 = scmp.lt.s32.totalorder %s3351_s1, %s3351_s1 }
  0x21   :  { %p3358_p0 = por %p3357_p13, %p3356_p12 }
  0x23   :  { %p3359_p1 = pnand %p3358_p0, %p3352_p11 }
  0x25   :  { %3362 = shalt.err (!%p3359_p1)
}
  0x26   :  { %73 = dma.hbm_to_vmem [thread:$0]  %s3950_s5, 512, %s68_s18, [#allocation9], %s3530_s13, %s3530_s13, %s3531_s14  }
  0x27   :  { %s3363_s16 = scalar_lea.hbm %s3952_s7, 512 }
  0x28   :  { %p3364_p2 = scmp.ne.s32.totalorder %s3952_s7, %s3363_s16  ;;  %p3367_p3 = scmp.lt.u32.totalorder %s3363_s16, %s3952_s7 }
  0x2a   :  { %p3369_p4 = pnand %p3367_p3, %p3364_p2 }
  0x2c   :  { %3372 = shalt.err (!%p3369_p4)
}
  0x2d   :  { %s3373_s24 = scalar_lea.vmem %s90_s20, 512  ;;  %p3378_p6 = scmp.lt.s32.totalorder %s90_s20, %s90_s20 }
  0x2e   :  { %p3374_p5 = scmp.ne.s32.totalorder %s90_s20, %s3373_s24  ;;  %p3379_p7 = scmp.lt.s32.totalorder %s3373_s24, %s3373_s24 }
  0x30   :  { %p3380_p8 = por %p3379_p7, %p3378_p6 }
  0x32   :  { %p3381_p9 = pnand %p3380_p8, %p3374_p5 }
  0x34   :  { %3384 = shalt.err (!%p3381_p9)
}
  0x35   :  { %95 = dma.hbm_to_vmem [thread:$0]  %s3952_s7, 512, %s90_s20, [#allocation12], %s3530_s13, %s3530_s13, %s3531_s14  }
  0x36   :  { %s3534_s25 = smov [#allocation2]   ;;  %s3535_s27 = smov [#allocation7]  }
  0x37   :  { %s30_s26 = sshll.u32 %s3534_s25, 4  ;;  %s53_s28 = sshll.u32 %s3535_s27, 4  ;;  %s31_s26 = int_to_ptr.vmem [resolvable:$true] %s30_s26  ;;  %s54_s28 = int_to_ptr.vmem [resolvable:$true] %s53_s28 }
  0x38   :  { %s3385_s29 = scalar_lea.hbm %s3945_s0, 128 }
  0x39   :  { %p3386_p10 = scmp.ne.s32.totalorder %s3945_s0, %s3385_s29  ;;  %p3389_p11 = scmp.lt.u32.totalorder %s3385_s29, %s3945_s0 }
  0x3b   :  { %p3391_p12 = pnand %p3389_p11, %p3386_p10 }
  0x3d   :  { %3394 = shalt.err (!%p3391_p12)
}
  0x3e   :  { %s3395_s7 = scalar_lea.vmem %s31_s26, 128  ;;  %p3400_p0 = scmp.lt.s32.totalorder %s31_s26, %s31_s26 }
  0x3f   :  { %p3396_p13 = scmp.ne.s32.totalorder %s31_s26, %s3395_s7  ;;  %p3401_p1 = scmp.lt.s32.totalorder %s3395_s7, %s3395_s7 }
  0x41   :  { %p3402_p2 = por %p3401_p1, %p3400_p0 }
  0x43   :  { %p3403_p3 = pnand %p3402_p2, %p3396_p13 }
  0x45   :  { %3406 = shalt.err (!%p3403_p3)
}
  0x46   :  { %33 = dma.hbm_to_vmem [thread:$0]  %s3945_s0, 128, %s31_s26, [#allocation3]  }
  0x47   :  { %s3407_s24 = scalar_lea.hbm %s3948_s3, 512 }
  0x48   :  { %p3408_p4 = scmp.ne.s32.totalorder %s3948_s3, %s3407_s24  ;;  %p3411_p5 = scmp.lt.u32.totalorder %s3407_s24, %s3948_s3 }
  0x4a   :  { %p3413_p6 = pnand %p3411_p5, %p3408_p4 }
  0x4c   :  { %3416 = shalt.err (!%p3413_p6)
}
  0x4d   :  { %s3417_s1 = scalar_lea.vmem %s54_s28, 512  ;;  %p3422_p8 = scmp.lt.s32.totalorder %s54_s28, %s54_s28 }
  0x4e   :  { %p3418_p7 = scmp.ne.s32.totalorder %s54_s28, %s3417_s1  ;;  %p3423_p9 = scmp.lt.s32.totalorder %s3417_s1, %s3417_s1 }
  0x50   :  { %p3424_p10 = por %p3423_p9, %p3422_p8 }
  0x52   :  { %p3425_p11 = pnand %p3424_p10, %p3418_p7 }
  0x54   :  { %3428 = shalt.err (!%p3425_p11)
}
  0x55   :  { %59 = dma.hbm_to_vmem [thread:$0]  %s3948_s3, 512, %s54_s28, [#allocation6], %s3530_s13, %s3530_s13, %s3531_s14  }
  0x56   :  { %s3536_s22 = smov [#allocation10]   ;;  %s3537_s30 = smov [#allocation13]  }
  0x57   :  { %s80_s29 = sshll.u32 %s3536_s22, 4  ;;  %s102_s15 = sshll.u32 %s3537_s30, 4  ;;  %s81_s29 = int_to_ptr.vmem [resolvable:$true] %s80_s29  ;;  %s103_s15 = int_to_ptr.vmem [resolvable:$true] %s102_s15 }
  0x58   :  { %s3429_s7 = scalar_lea.hbm %s3951_s6, 16 }
  0x59   :  { %p3430_p12 = scmp.ne.s32.totalorder %s3951_s6, %s3429_s7  ;;  %p3433_p13 = scmp.lt.u32.totalorder %s3429_s7, %s3951_s6 }
  0x5b   :  { %p3435_p0 = pnand %p3433_p13, %p3430_p12 }
  0x5d   :  { %3438 = shalt.err (!%p3435_p0)
}
  0x5e   :  { %s3439_s3 = scalar_lea.vmem %s81_s29, 16  ;;  %s3443_s13 = scalar_lea.vmem %s81_s29, 32 }
  0x5f   :  { %p3440_p1 = scmp.ne.s32.totalorder %s81_s29, %s3439_s3  ;;  %p3444_p2 = scmp.lt.s32.totalorder %s81_s29, %s81_s29 }
  0x60   :  { %p3445_p3 = scmp.lt.s32.totalorder %s3443_s13, %s3439_s3 }
  0x62   :  { %p3446_p4 = por %p3445_p3, %p3444_p2 }
  0x64   :  { %p3447_p5 = pnand %p3446_p4, %p3440_p1 }
  0x66   :  { %3450 = shalt.err (!%p3447_p5)
}
  0x67   :  { %83 = dma.hbm_to_vmem [thread:$0]  %s3951_s6, 16, %s81_s29, [#allocation9]  }
  0x68   :  { %s3451_s18 = scalar_lea.hbm %s3953_s8, 16 }
  0x69   :  { %p3452_p6 = scmp.ne.s32.totalorder %s3953_s8, %s3451_s18  ;;  %p3455_p7 = scmp.lt.u32.totalorder %s3451_s18, %s3953_s8 }
  0x6b   :  { %p3457_p8 = pnand %p3455_p7, %p3452_p6 }
  0x6d   :  { %3460 = shalt.err (!%p3457_p8)
}
  0x6e   :  { %s3461_s26 = scalar_lea.vmem %s103_s15, 16  ;;  %s3465_s22 = scalar_lea.vmem %s103_s15, 32 }
  0x6f   :  { %p3462_p9 = scmp.ne.s32.totalorder %s103_s15, %s3461_s26  ;;  %p3466_p10 = scmp.lt.s32.totalorder %s103_s15, %s103_s15 }
  0x70   :  { %p3467_p11 = scmp.lt.s32.totalorder %s3465_s22, %s3461_s26 }
  0x72   :  { %p3468_p12 = por %p3467_p11, %p3466_p10 }
  0x74   :  { %p3469_p13 = pnand %p3468_p12, %p3462_p9 }
  0x76   :  { %3472 = shalt.err (!%p3469_p13)
}
  0x77   :  { %105 = dma.hbm_to_vmem [thread:$0]  %s3953_s8, 16, %s103_s15, [#allocation12]  }
  0x78   :  { %3517 = dma.done.wait [#allocation3], 128  }
  0x79   :  { %3518 = vsyncadd [#allocation3], 4294967168 }
  0x7a   :  { %3519 = dma.done.wait [#allocation6], 768  }
  0x7b   :  { %3520 = vsyncadd [#allocation6], 4294966528 }
  0x7c   :  { %3521 = dma.done.wait [#allocation9], 528  }
  0x7d   :  { %3522 = vsyncadd [#allocation9], 4294966768 }
  0x7e   :  { %3523 = dma.done.wait [#allocation12], 528  }
  0x7f   :  { %3524 = vsyncadd [#allocation12], 4294966768  ;;  %v3538_v0 = vmov 0.0|0.0   ;;  %vm3539_vm0 = vmmov 0   ;;  %v3540_v1 = vmov 0.0   ;;  %vm141_vm1 = vcmask 130048  }
  0x80   :  { %3093 = vmatprep.subr.bf16.mxu0 %v3538_v0  ;;  %2795 = vmatprep.mubr.msk.f32.mxu0 %vm3539_vm0, %v3540_v1  ;;  %v132_v2 = vld [vmem:[#allocation5] sm:$0xff]  ;;  %v133_v3 = vld [vmem:[#allocation5 + $0x8] sm:$0xff]  ;;  %v131_v4 = vld [vmem:[#allocation2] sm:$0xff]  ;;  %vm618_vm3 = vcmask 261120   ;;  %s3541_s13 = smov [#allocation14]   ;;  %s3542_s28 = smov [#allocation15]  }
  0x81   :  { %3090 = vmatprep.subr.bf16.mxu1 %v3538_v0  ;;  %2788 = vmatprep.mubr.msk.f32.mxu1 %vm3539_vm0, %v3540_v1  ;;  %v146_v5 = vand.u32 4294901760, %v132_v2  ;;  %v149_v6 = vand.u32 4294901760, %v133_v3  ;;  %v143_v7 = vsel %vm141_vm1, %v131_v4, 0  ;;  %v607_v25 = vld [vmem:[#allocation7] sm:$0xff]  ;;  %v608_v26 = vld [vmem:[#allocation7 + $0x8] sm:$0xff]  ;;  %v609_v32 = vld [vmem:[#allocation7 + $0x10] sm:$0xff] }
  0x82   :  { %v212_v8 = vand.u32 4294901760, %v143_v7  ;;  %v623_v27 = vand.u32 4294901760, %v607_v25  ;;  %v626_v28 = vand.u32 4294901760, %v608_v26  ;;  %v610_v33 = vld [vmem:[#allocation7 + $0x18] sm:$0xff]  ;;  %v629_v34 = vand.u32 4294901760, %v609_v32  ;;  %s2615_s14 = sshll.u32 %s3541_s13, 4  ;;  %s2616_s14 = int_to_ptr.vmem [resolvable:$true] %s2615_s14 }
  0x83   :  { %v224_v9 = vsub.f32 %v132_v2, %v146_v5  ;;  %v231_v10 = vsub.f32 %v133_v3, %v149_v6  ;;  %v3091_v11 = vpack.c.bf16 %v149_v6, %v146_v5  ;;  %v632_v35 = vand.u32 4294901760, %v610_v33  ;;  %v2641_v59 = vld [vmem:[%s3947_s2] ss:$0 sm:$0xff]  ;;  %s2625_s24 = sshll.u32 %s3542_s28, 4  ;;  %s3473_s5 = scalar_lea.vmem %s2616_s14, 128  ;;  %s2626_s24 = int_to_ptr.vmem [resolvable:$true] %s2625_s24 }
  0x84   :  { %v213_v12 = vsub.f32 %v143_v7, %v212_v8  ;;  %v3728_v29 = vpack.c.bf16 %v626_v28, %v623_v27  ;;  %v703_v30 = vsub.f32 %v607_v25, %v623_v27  ;;  %v710_v31 = vsub.f32 %v608_v26, %v626_v28  ;;  %p3474_p0 = scmp.ne.s32.totalorder %s2616_s14, %s3473_s5  ;;  %p3478_p1 = scmp.lt.s32.totalorder %s2616_s14, %s2616_s14 }
  0x85   :  { %v225_v13 = vand.u32 4294901760, %v224_v9  ;;  %v232_v14 = vand.u32 4294901760, %v231_v10  ;;  %3092 = vmatpush3.bf16.msra.mxu1 %v3091_v11  ;;  %v3097_v23 = vpack.c.bf16 %v231_v10, %v224_v9  ;;  %v3732_v38 = vpack.c.bf16 %v632_v35, %v629_v34  ;;  %p3479_p2 = scmp.lt.s32.totalorder %s3473_s5, %s3473_s5 }
  0x86   :  { %v214_v15 = vand.u32 4294901760, %v213_v12  ;;  %3108 = vmatprep.subr.bf16.mxu1 %v3538_v0  ;;  %v704_v36 = vand.u32 4294901760, %v703_v30  ;;  %v711_v37 = vand.u32 4294901760, %v710_v31  ;;  %v717_v39 = vsub.f32 %v609_v32, %v629_v34 }
  0x87   :  { %v226_v16 = vsub.f32 %v224_v9, %v225_v13  ;;  %v233_v17 = vsub.f32 %v231_v10, %v232_v14  ;;  %v3103_v24 = vpack.c.bf16 %v232_v14, %v225_v13  ;;  %v724_v40 = vsub.f32 %v610_v33, %v632_v35  ;;  %v1110_v10 = vld [vmem:[#allocation8] sm:$0xff]  ;;  %p3480_p3 = por %p3479_p2, %p3478_p1 }
  0x88   :  { %v215_v18 = vsub.f32 %v213_v12, %v214_v15  ;;  %v705_v41 = vsub.f32 %v703_v30, %v704_v36  ;;  %v712_v42 = vsub.f32 %v710_v31, %v711_v37  ;;  %v718_v44 = vand.u32 4294901760, %v717_v39 }
  0x89   :  { %v227_v19 = vand.u32 4294901760, %v226_v16  ;;  %v234_v20 = vand.u32 4294901760, %v233_v17  ;;  %v725_v45 = vand.u32 4294901760, %v724_v40  ;;  %v3121_v53 = vpack.c.bf16 %v710_v31, %v703_v30  ;;  %v1112_v16 = vld [vmem:[#allocation8 + $0x10] sm:$0xff]  ;;  %v1113_v17 = vld [vmem:[#allocation8 + $0x18] sm:$0xff]  ;;  %p3481_p4 = pnand %p3480_p3, %p3474_p0 }
  0x8a   :  { %v216_v21 = vand.u32 4294901760, %v215_v18  ;;  %v706_v43 = vand.u32 4294901760, %v705_v41  ;;  %v713_v46 = vand.u32 4294901760, %v712_v42  ;;  %v719_v47 = vsub.f32 %v717_v39, %v718_v44  ;;  %v2642_v42 = vld [vmem:[%s3949_s4] ss:$0 sm:$0xff] }
  0x8b   :  { %v3094_v22 = vpack.c.bf16 %v234_v20, %v227_v19  ;;  %v726_v48 = vsub.f32 %v724_v40, %v725_v45  ;;  %v3124_v54 = vpack.c.bf16 %v724_v40, %v717_v39  ;;  %v3133_v55 = vpack.c.bf16 %v711_v37, %v704_v36 }
  0x8c   :  { %2789 = vmatmul.mubr.f32.vlgmr.msra.gmra.mrb[0].mxu1 %v216_v21  ;;  %v3115_v49 = vpack.c.bf16 %v713_v46, %v706_v43  ;;  %v720_v50 = vand.u32 4294901760, %v719_v47  ;;  %v3136_v56 = vpack.c.bf16 %v725_v45, %v718_v44  ;;  %v1131_v20 = vand.u32 4294901760, %v1112_v16 }
  0x8d   :  { %3095 = vmatpush3.bf16.msra.mxu0 %v3094_v22  ;;  %2834 = vmatprep.mubr.msk.f32.mxu1 %vm3539_vm0, %v3540_v1  ;;  %v727_v51 = vand.u32 4294901760, %v726_v48  ;;  %v1134_v21 = vand.u32 4294901760, %v1113_v17 }
  0x8e   :  { %3096 = vmatprep.subr.bf16.mxu0 %v3538_v0  ;;  %3110 = vmatpush3.bf16.msra.mxu1 %v3728_v29 }
  0x8f   :  { %3111 = vmatprep.subr.bf16.mxu1 %v3538_v0  ;;  %v3118_v52 = vpack.c.bf16 %v727_v51, %v720_v50  ;;  %v1226_v25 = vsub.f32 %v1113_v17, %v1134_v21 }
  0x90   :  { %2796 = vmatmul.mubr.f32.vlgmr.msra.gmra.mrb[0].mxu0 %v212_v8 }
  0x91   :  { %3098 = vmatpush3.bf16.msra.mxu0 %v3097_v23  ;;  %2802 = vmatprep.mubr.msk.f32.mxu0 %vm3539_vm0, %v3540_v1 }
  0x92   :  { %3099 = vmatprep.subr.bf16.mxu0 %v3538_v0  ;;  %3113 = vmatpush3.bf16.msra.mxu1 %v3732_v38 }
  0x93   :  { %3114 = vmatprep.subr.bf16.mxu1 %v3538_v0 }
  0x98   :  { %2803 = vmatmul.mubr.f32.vlgmr.msra.gmra.mrb[0].mxu0 %v213_v12  ;;  %v1125_v12 = vand.u32 4294901760, %v1110_v10 }
  0x99   :  { %3101 = vmatpush3.bf16.msra.mxu0 %v3091_v11  ;;  %2809 = vmatprep.mubr.msk.f32.mxu0 %vm3539_vm0, %v3540_v1 }
  0x9a   :  { %3102 = vmatprep.subr.bf16.mxu0 %v3538_v0  ;;  %v1205_v14 = vsub.f32 %v1110_v10, %v1125_v12 }
  0x9c   :  { %v1206_v18 = vand.u32 4294901760, %v1205_v14 }
  0x9e   :  { %v1207_v22 = vsub.f32 %v1205_v14, %v1206_v18 }
  0xa0   :  { %2810 = vmatmul.mubr.f32.vlgmr.msra.gmra.mrb[0].mxu0 %v214_v15  ;;  %v1208_v26 = vand.u32 4294901760, %v1207_v22 }
  0xa1   :  { %3104 = vmatpush3.bf16.msra.mxu0 %v3103_v24  ;;  %2816 = vmatprep.mubr.msk.f32.mxu0 %vm3539_vm0, %v3540_v1  ;;  %v1219_v24 = vsub.f32 %v1112_v16, %v1131_v20 }
  0xa2   :  { %3105 = vmatprep.subr.bf16.mxu0 %v3538_v0 }
  0xa3   :  { %v1220_v28 = vand.u32 4294901760, %v1219_v24  ;;  %v3160_v39 = vpack.c.bf16 %v1226_v25, %v1219_v24 }
  0xa5   :  { %v1221_v31 = vsub.f32 %v1219_v24, %v1220_v28 }
  0xa7   :  { %v1222_v33 = vand.u32 4294901760, %v1221_v31 }
  0xa8   :  { %2817 = vmatmul.mubr.f32.vlgmr.msra.gmra.mrb[0].mxu0 %v212_v8 }
  0xa9   :  { %3107 = vmatpush3.bf16.msra.mxu0 %v3091_v11  ;;  %2823 = vmatprep.mubr.msk.f32.mxu0 %vm3539_vm0, %v3540_v1  ;;  %v1111_v11 = vld [vmem:[#allocation8 + $0x8] sm:$0xff] }
  0xaa   :  { %3150 = vmatprep.subr.bf16.mxu0 %v3538_v0  ;;  %v1128_v13 = vand.u32 4294901760, %v1111_v11 }
  0xac   :  { %v1212_v15 = vsub.f32 %v1111_v11, %v1128_v13  ;;  %v3145_v36 = vpack.c.bf16 %v1128_v13, %v1125_v12  ;;  %v2115_v11 = vld [vmem:[%s3954_s9 + $0x18] sm:$0xff] }
  0xae   :  { %v1213_v19 = vand.u32 4294901760, %v1212_v15  ;;  %v3157_v37 = vpack.c.bf16 %v1212_v15, %v1205_v14  ;;  %v2133_v14 = vand.u32 4294901760, %v2115_v11 }
  0xb0   :  { %2824 = vmatmul.mubr.f32.vlgmr.msra.gmra.mrb[0].mxu0 %v212_v8  ;;  %v1214_v23 = vsub.f32 %v1212_v15, %v1213_v19  ;;  %v3169_v40 = vpack.c.bf16 %v1213_v19, %v1206_v18 }
  0xb1   :  { %2911 = vmatprep.mubr.msk.f32.mxu0 %vm3539_vm0, %v3540_v1 }
  0xb2   :  { %v1215_v27 = vand.u32 4294901760, %v1214_v23  ;;  %v3836_v23 = vsub.f32 %v2115_v11, %v2133_v14 }
  0xb4   :  { %v3151_v30 = vpack.c.bf16 %v1215_v27, %v1208_v26 }
  0xb6   :  { %3152 = vmatpush3.bf16.msra.mxu0 %v3151_v30 }
  0xb7   :  { %3153 = vmatprep.subr.bf16.mxu0 %v3538_v0 }
 0x15f   :  { %v218_v57 = vpop.f32.mrb[0].mxu1 }
 0x160   :  { %v2790_v58 = vpop.f32.mrb[1].mxu1  ;;  %v219_v60 = vadd.f32 %v2641_v59, %v218_v57  ;;  %v2113_v59 = vld [vmem:[%s3954_s9 + $0x8] sm:$0xff] }
 0x183   :  { %v600_v61 = vpop.f32.mrb[0].mxu0 }
 0x184   :  { %v3253_v62 = vadd.f32 %v600_v61, %v219_v60  ;;  %v2825_v63 = vpop.f32.mrb[1].mxu0  ;;  %v2127_v61 = vand.u32 4294901760, %v2113_v59 }
 0x186   :  { %vm604_vm2 = vcmp.ge.f32.partialorder %v3253_v62, 0.0  ;;  %v605_v2 = vmul.f32 0.2, %v3253_v62 }
 0x188   :  { %v606_v3 = vsel %vm604_vm2, %v3253_v62, %v605_v2 }
 0x189   :  { %v620_v4 = vsel %vm618_vm3, %v606_v3, 0 }
 0x18a   :  { %v691_v5 = vand.u32 4294901760, %v620_v4 }
 0x18c   :  { %v692_v6 = vsub.f32 %v620_v4, %v691_v5 }
 0x18e   :  { %v693_v7 = vand.u32 4294901760, %v692_v6 }
 0x190   :  { %v694_v8 = vsub.f32 %v692_v6, %v693_v7 }
 0x192   :  { %v695_v9 = vand.u32 4294901760, %v694_v8  ;;  %v2114_v8 = vld [vmem:[%s3954_s9 + $0x10] sm:$0xff] }
 0x193   :  { %v2130_v12 = vand.u32 4294901760, %v2114_v8 }
 0x194   :  { %2835 = vmatmul.mubr.f32.vlgmr.msra.gmra.mrb[2].mxu1 %v695_v9 }
 0x195   :  { %3116 = vmatpush3.bf16.msra.mxu1 %v3115_v49  ;;  %2845 = vmatprep.mubr.msk.f32.mxu1 %vm3539_vm0, %v3540_v1  ;;  %v3834_v22 = vpack.c.bf16 %v2133_v14, %v2130_v12 }
 0x196   :  { %3117 = vmatprep.subr.bf16.mxu1 %v3538_v0 }
 0x199   :  { %3119 = vmatpush3.bf16.msra.mxu1 %v3118_v52 }
 0x19a   :  { %3120 = vmatprep.subr.bf16.mxu1 %v3538_v0 }
 0x19c   :  { %2846 = vmatmul.mubr.f32.vlgmr.msra.gmra.mrb[2].mxu1 %v691_v5 }
 0x19d   :  { %3122 = vmatpush3.bf16.msra.mxu1 %v3121_v53  ;;  %2856 = vmatprep.mubr.msk.f32.mxu1 %vm3539_vm0, %v3540_v1 }
 0x19e   :  { %3123 = vmatprep.subr.bf16.mxu1 %v3538_v0 }
 0x1a1   :  { %3125 = vmatpush3.bf16.msra.mxu1 %v3124_v54  ;;  %v1612_v54 = vld [vmem:[#allocation11] sm:$0xff] }
 0x1a2   :  { %3126 = vmatprep.subr.bf16.mxu1 %v3538_v0  ;;  %v1627_v57 = vand.u32 4294901760, %v1612_v54 }
 0x1a4   :  { %2857 = vmatmul.mubr.f32.vlgmr.msra.gmra.mrb[2].mxu1 %v692_v6  ;;  %v3802_v63 = vsub.f32 %v1612_v54, %v1627_v57  ;;  %v1614_v6 = vld [vmem:[#allocation11 + $0x10] sm:$0xff] }
 0x1a5   :  { %3128 = vmatpush3.bf16.msra.mxu1 %v3728_v29  ;;  %2867 = vmatprep.mubr.msk.f32.mxu1 %vm3539_vm0, %v3540_v1  ;;  %v1633_v9 = vand.u32 4294901760, %v1614_v6 }
 0x1a6   :  { %3129 = vmatprep.subr.bf16.mxu1 %v3538_v0  ;;  %v1708_v13 = vand.u32 4294901760, %v3802_v63 }
 0x1a7   :  { %v3828_v19 = vsub.f32 %v1614_v6, %v1633_v9 }
 0x1a8   :  { %v1709_v24 = vsub.f32 %v3802_v63, %v1708_v13 }
 0x1a9   :  { %3131 = vmatpush3.bf16.msra.mxu1 %v3732_v38 }
 0x1aa   :  { %3132 = vmatprep.subr.bf16.mxu1 %v3538_v0  ;;  %v1710_v30 = vand.u32 4294901760, %v1709_v24 }
 0x1ac   :  { %2868 = vmatmul.mubr.f32.vlgmr.msra.gmra.mrb[2].mxu1 %v693_v7  ;;  %v1615_v7 = vld [vmem:[#allocation11 + $0x18] sm:$0xff] }
 0x1ad   :  { %3134 = vmatpush3.bf16.msra.mxu1 %v3133_v55  ;;  %2878 = vmatprep.mubr.msk.f32.mxu1 %vm3539_vm0, %v3540_v1  ;;  %v1613_v55 = vld [vmem:[#allocation11 + $0x8] sm:$0xff]  ;;  %v1636_v10 = vand.u32 4294901760, %v1615_v7 }
 0x1ae   :  { %3135 = vmatprep.subr.bf16.mxu1 %v3538_v0  ;;  %v1630_v58 = vand.u32 4294901760, %v1613_v55 }
 0x1af   :  { %v3826_v18 = vpack.c.bf16 %v1636_v10, %v1633_v9 }
 0x1b0   :  { %v3800_v62 = vpack.c.bf16 %v1630_v58, %v1627_v57  ;;  %v3804_v2 = vsub.f32 %v1613_v55, %v1630_v58  ;;  %v2643_v58 = vld [vmem:[#allocation10] ss:$0 sm:$0xff] }
 0x1b1   :  { %3137 = vmatpush3.bf16.msra.mxu1 %v3136_v56  ;;  %v2112_v56 = vld [vmem:[%s3954_s9] sm:$0xff] }
 0x1b2   :  { %3138 = vmatprep.subr.bf16.mxu1 %v3538_v0  ;;  %v2124_v60 = vand.u32 4294901760, %v2112_v56  ;;  %v1715_v15 = vand.u32 4294901760, %v3804_v2 }
 0x1b4   :  { %2879 = vmatmul.mubr.f32.vlgmr.msra.gmra.mrb[2].mxu1 %v691_v5  ;;  %v3806_v3 = vsub.f32 %v2112_v56, %v2124_v60  ;;  %v3808_v4 = vpack.c.bf16 %v2127_v61, %v2124_v60 }
 0x1b5   :  { %3140 = vmatpush3.bf16.msra.mxu1 %v3728_v29  ;;  %2889 = vmatprep.mubr.msk.f32.mxu1 %vm3539_vm0, %v3540_v1  ;;  %v1227_v29 = vand.u32 4294901760, %v1226_v25 }
 0x1b6   :  { %3141 = vmatprep.subr.bf16.mxu1 %v3538_v0  ;;  %v2205_v16 = vand.u32 4294901760, %v3806_v3 }
 0x1b7   :  { %v1228_v32 = vsub.f32 %v1226_v25, %v1227_v29  ;;  %v3172_v41 = vpack.c.bf16 %v1227_v29, %v1220_v28  ;;  %v1716_v25 = vsub.f32 %v3804_v2, %v1715_v15  ;;  %v1722_v28 = vand.u32 4294901760, %v3828_v19 }
 0x1b8   :  { %v2206_v26 = vsub.f32 %v3806_v3, %v2205_v16 }
 0x1b9   :  { %3143 = vmatpush3.bf16.msra.mxu1 %v3732_v38  ;;  %v1229_v34 = vand.u32 4294901760, %v1228_v32  ;;  %v3148_v38 = vpack.c.bf16 %v1134_v21, %v1131_v20  ;;  %v3830_v20 = vsub.f32 %v1615_v7, %v1636_v10  ;;  %v3832_v21 = vsub.f32 %v2114_v8, %v2130_v12 }
 0x1ba   :  { %3144 = vmatprep.subr.bf16.mxu1 %v3538_v0  ;;  %v1717_v31 = vand.u32 4294901760, %v1716_v25 }
 0x1bb   :  { %v3154_v35 = vpack.c.bf16 %v1229_v34, %v1222_v33  ;;  %v1729_v29 = vand.u32 4294901760, %v3830_v20  ;;  %v2219_v32 = vand.u32 4294901760, %v3832_v21  ;;  %v2226_v33 = vand.u32 4294901760, %v3836_v23 }
 0x1bc   :  { %2890 = vmatmul.mubr.f32.vlgmr.msra.gmra.mrb[2].mxu1 %v691_v5  ;;  %v3810_v5 = vsub.f32 %v2113_v59, %v2127_v61  ;;  %v2207_v34 = vand.u32 4294901760, %v2206_v26 }
 0x1bd   :  { %2900 = vmatprep.mubr.msk.f32.mxu1 %vm3539_vm0, %v3540_v1  ;;  %3155 = vmatpush3.bf16.msra.mxu0 %v3154_v35  ;;  %v3208_v54 = vpack.c.bf16 %v1729_v29, %v1722_v28  ;;  %v3244_v55 = vpack.c.bf16 %v2226_v33, %v2219_v32 }
 0x1be   :  { %3156 = vmatprep.subr.bf16.mxu0 %v3538_v0  ;;  %3146 = vmatpush3.bf16.msra.mxu1 %v3145_v36  ;;  %v2212_v17 = vand.u32 4294901760, %v3810_v5 }
 0x1bf   :  { %3147 = vmatprep.subr.bf16.mxu1 %v3538_v0 }
 0x1c0   :  { %v2213_v27 = vsub.f32 %v3810_v5, %v2212_v17 }
 0x1c2   :  { %3149 = vmatpush3.bf16.msra.mxu1 %v3148_v38  ;;  %v2214_v35 = vand.u32 4294901760, %v2213_v27 }
 0x1c3   :  { %3180 = vmatprep.subr.bf16.mxu1 %v3538_v0 }
 0x28f   :  { %v1103_v43 = vpop.f32.mrb[2].mxu1 }
 0x290   :  { %v3254_v44 = vadd.f32 %v2642_v42, %v1103_v43  ;;  %v2891_v45 = vpop.f32.mrb[3].mxu1 }
 0x292   :  { %vm1107_vm4 = vcmp.ge.f32.partialorder %v3254_v44, 0.0  ;;  %v1108_v46 = vmul.f32 0.2, %v3254_v44 }
 0x294   :  { %v1109_v47 = vsel %vm1107_vm4, %v3254_v44, %v1108_v46 }
 0x295   :  { %v1122_v48 = vsel %vm618_vm3, %v1109_v47, 0 }
 0x296   :  { %v1193_v49 = vand.u32 4294901760, %v1122_v48 }
 0x298   :  { %v1194_v50 = vsub.f32 %v1122_v48, %v1193_v49  ;;  %2912 = vmatmul.mubr.f32.vlgmr.msra.gmra.mrb[2].mxu0 %v1193_v49  ;;  %v3193_v48 = vpack.c.bf16 %v3804_v2, %v3802_v63 }
 0x299   :  { %3158 = vmatpush3.bf16.msra.mxu0 %v3157_v37  ;;  %2922 = vmatprep.mubr.msk.f32.mxu0 %vm3539_vm0, %v3540_v1  ;;  %v1730_v37 = vsub.f32 %v3830_v20, %v1729_v29 }
 0x29a   :  { %3159 = vmatprep.subr.bf16.mxu0 %v3538_v0  ;;  %v1195_v51 = vand.u32 4294901760, %v1194_v50 }
 0x29b   :  { %v1731_v43 = vand.u32 4294901760, %v1730_v37 }
 0x29c   :  { %v1196_v52 = vsub.f32 %v1194_v50, %v1195_v51 }
 0x29d   :  { %3161 = vmatpush3.bf16.msra.mxu0 %v3160_v39  ;;  %v2220_v39 = vsub.f32 %v3832_v21, %v2219_v32 }
 0x29e   :  { %v1197_v53 = vand.u32 4294901760, %v1196_v52  ;;  %3162 = vmatprep.subr.bf16.mxu0 %v3538_v0  ;;  %v3205_v52 = vpack.c.bf16 %v1715_v15, %v1708_v13 }
 0x29f   :  { %v2221_v44 = vand.u32 4294901760, %v2220_v39 }
 0x2a0   :  { %2901 = vmatmul.mubr.f32.vlgmr.msra.gmra.mrb[4].mxu1 %v1197_v53  ;;  %2923 = vmatmul.mubr.f32.vlgmr.msra.gmra.mrb[2].mxu0 %v1194_v50  ;;  %v3196_v50 = vpack.c.bf16 %v3830_v20, %v3828_v19  ;;  %v3241_v53 = vpack.c.bf16 %v2212_v17, %v2205_v16 }
 0x2a1   :  { %3164 = vmatpush3.bf16.msra.mxu0 %v3145_v36  ;;  %2933 = vmatprep.mubr.msk.f32.mxu0 %vm3539_vm0, %v3540_v1 }
 0x2a2   :  { %3165 = vmatprep.subr.bf16.mxu0 %v3538_v0  ;;  %2966 = vmatprep.mubr.msk.f32.mxu1 %vm3539_vm0, %v3540_v1 }
 0x2a3   :  { %3182 = vmatpush3.bf16.msra.mxu1 %v3800_v62 }
 0x2a4   :  { %3183 = vmatprep.subr.bf16.mxu1 %v3538_v0 }
 0x2a5   :  { %3167 = vmatpush3.bf16.msra.mxu0 %v3148_v38 }
 0x2a6   :  { %3168 = vmatprep.subr.bf16.mxu0 %v3538_v0 }
 0x2a7   :  { %3185 = vmatpush3.bf16.msra.mxu1 %v3826_v18 }
 0x2a8   :  { %2934 = vmatmul.mubr.f32.vlgmr.msra.gmra.mrb[2].mxu0 %v1195_v51  ;;  %3186 = vmatprep.subr.bf16.mxu1 %v3538_v0  ;;  %v3232_v51 = vpack.c.bf16 %v3836_v23, %v3832_v21 }
 0x2a9   :  { %3170 = vmatpush3.bf16.msra.mxu0 %v3169_v40  ;;  %2944 = vmatprep.mubr.msk.f32.mxu0 %vm3539_vm0, %v3540_v1  ;;  %v2227_v40 = vsub.f32 %v3836_v23, %v2226_v33 }
 0x2aa   :  { %3171 = vmatprep.subr.bf16.mxu0 %v3538_v0 }
 0x2ab   :  { %v2228_v45 = vand.u32 4294901760, %v2227_v40 }
 0x2ad   :  { %3173 = vmatpush3.bf16.msra.mxu0 %v3172_v41  ;;  %v3223_v41 = vpack.c.bf16 %v2214_v35, %v2207_v34  ;;  %v3226_v47 = vpack.c.bf16 %v2228_v45, %v2221_v44 }
 0x2ae   :  { %3174 = vmatprep.subr.bf16.mxu0 %v3538_v0 }
 0x2b0   :  { %2945 = vmatmul.mubr.f32.vlgmr.msra.gmra.mrb[2].mxu0 %v1193_v49 }
 0x2b1   :  { %3176 = vmatpush3.bf16.msra.mxu0 %v3145_v36  ;;  %2955 = vmatprep.mubr.msk.f32.mxu0 %vm3539_vm0, %v3540_v1  ;;  %v1723_v36 = vsub.f32 %v3828_v19, %v1722_v28 }
 0x2b2   :  { %3177 = vmatprep.subr.bf16.mxu0 %v3538_v0 }
 0x2b3   :  { %v1724_v42 = vand.u32 4294901760, %v1723_v36 }
 0x2b5   :  { %3179 = vmatpush3.bf16.msra.mxu0 %v3148_v38  ;;  %v3187_v38 = vpack.c.bf16 %v1717_v31, %v1710_v30  ;;  %v3190_v46 = vpack.c.bf16 %v1731_v43, %v1724_v42 }
 0x2b6   :  { %3216 = vmatprep.subr.bf16.mxu0 %v3538_v0 }
 0x2b8   :  { %2956 = vmatmul.mubr.f32.vlgmr.msra.gmra.mrb[2].mxu0 %v1193_v49  ;;  %v3229_v49 = vpack.c.bf16 %v3810_v5, %v3806_v3 }
 0x2b9   :  { %3032 = vmatprep.mubr.msk.f32.mxu0 %vm3539_vm0, %v3540_v1  ;;  %3218 = vmatpush3.bf16.msra.mxu0 %v3808_v4 }
 0x2ba   :  { %3219 = vmatprep.subr.bf16.mxu0 %v3538_v0 }
 0x2bd   :  { %3221 = vmatpush3.bf16.msra.mxu0 %v3834_v22 }
 0x2be   :  { %3222 = vmatprep.subr.bf16.mxu0 %v3538_v0 }
 0x373   :  { %v1199_v56 = vpop.f32.mrb[4].mxu1 }
 0x374   :  { %v2902_v57 = vpop.f32.mrb[5].mxu1  ;;  %v1200_v59 = vadd.f32 %v2643_v58, %v1199_v56 }
 0x38b   :  { %v1605_v60 = vpop.f32.mrb[2].mxu0 }
 0x38c   :  { %v3256_v61 = vadd.f32 %v1605_v60, %v1200_v59  ;;  %v2957_v63 = vpop.f32.mrb[3].mxu0 }
 0x38e   :  { %vm1609_vm5 = vcmp.ge.f32.partialorder %v3256_v61, 0.0  ;;  %v1610_v2 = vmul.f32 0.2, %v3256_v61 }
 0x390   :  { %v1611_v3 = vsel %vm1609_vm5, %v3256_v61, %v1610_v2 }
 0x391   :  { %v1624_v5 = vsel %vm618_vm3, %v1611_v3, 0 }
 0x392   :  { %v3863_v6 = vand.u32 4294901760, %v1624_v5 }
 0x394   :  { %v1696_v7 = vsub.f32 %v1624_v5, %v3863_v6 }
 0x396   :  { %v1697_v8 = vand.u32 4294901760, %v1696_v7 }
 0x398   :  { %v1698_v9 = vsub.f32 %v1696_v7, %v1697_v8 }
 0x39a   :  { %v1699_v10 = vand.u32 4294901760, %v1698_v9 }
 0x39c   :  { %2967 = vmatmul.mubr.f32.vlgmr.msra.gmra.mrb[6].mxu1 %v1699_v10  ;;  %3033 = vmatmul.mubr.f32.vlgmr.msra.gmra.mrb[4].mxu0 %v1699_v10 }
 0x39d   :  { %3188 = vmatpush3.bf16.msra.mxu1 %v3187_v38  ;;  %3224 = vmatpush3.bf16.msra.mxu0 %v3223_v41 }
 0x39e   :  { %3189 = vmatprep.subr.bf16.mxu1 %v3538_v0  ;;  %3225 = vmatprep.subr.bf16.mxu0 %v3538_v0 }
 0x39f   :  { %2977 = vmatprep.mubr.msk.f32.mxu1 %vm3539_vm0, %v3540_v1  ;;  %3043 = vmatprep.mubr.msk.f32.mxu0 %vm3539_vm0, %v3540_v1 }
 0x3a1   :  { %3191 = vmatpush3.bf16.msra.mxu1 %v3190_v46  ;;  %3227 = vmatpush3.bf16.msra.mxu0 %v3226_v47 }
 0x3a2   :  { %3192 = vmatprep.subr.bf16.mxu1 %v3538_v0  ;;  %3228 = vmatprep.subr.bf16.mxu0 %v3538_v0 }
 0x3a4   :  { %2978 = vmatmul.mubr.f32.vlgmr.msra.gmra.mrb[6].mxu1 %v3863_v6  ;;  %3044 = vmatmul.mubr.f32.vlgmr.msra.gmra.mrb[4].mxu0 %v3863_v6 }
 0x3a5   :  { %3194 = vmatpush3.bf16.msra.mxu1 %v3193_v48  ;;  %3230 = vmatpush3.bf16.msra.mxu0 %v3229_v49 }
 0x3a6   :  { %3195 = vmatprep.subr.bf16.mxu1 %v3538_v0  ;;  %3231 = vmatprep.subr.bf16.mxu0 %v3538_v0 }
 0x3a7   :  { %2988 = vmatprep.mubr.msk.f32.mxu1 %vm3539_vm0, %v3540_v1  ;;  %3054 = vmatprep.mubr.msk.f32.mxu0 %vm3539_vm0, %v3540_v1 }
 0x3a9   :  { %3197 = vmatpush3.bf16.msra.mxu1 %v3196_v50  ;;  %3233 = vmatpush3.bf16.msra.mxu0 %v3232_v51 }
 0x3aa   :  { %3198 = vmatprep.subr.bf16.mxu1 %v3538_v0  ;;  %3234 = vmatprep.subr.bf16.mxu0 %v3538_v0 }
 0x3ac   :  { %2989 = vmatmul.mubr.f32.vlgmr.msra.gmra.mrb[6].mxu1 %v1696_v7  ;;  %3055 = vmatmul.mubr.f32.vlgmr.msra.gmra.mrb[4].mxu0 %v1696_v7 }
 0x3ad   :  { %3200 = vmatpush3.bf16.msra.mxu1 %v3800_v62  ;;  %3236 = vmatpush3.bf16.msra.mxu0 %v3808_v4 }
 0x3ae   :  { %3201 = vmatprep.subr.bf16.mxu1 %v3538_v0  ;;  %3237 = vmatprep.subr.bf16.mxu0 %v3538_v0 }
 0x3af   :  { %2999 = vmatprep.mubr.msk.f32.mxu1 %vm3539_vm0, %v3540_v1  ;;  %3065 = vmatprep.mubr.msk.f32.mxu0 %vm3539_vm0, %v3540_v1 }
 0x3b1   :  { %3203 = vmatpush3.bf16.msra.mxu1 %v3826_v18  ;;  %3239 = vmatpush3.bf16.msra.mxu0 %v3834_v22 }
 0x3b2   :  { %3204 = vmatprep.subr.bf16.mxu1 %v3538_v0  ;;  %3240 = vmatprep.subr.bf16.mxu0 %v3538_v0 }
 0x3b4   :  { %3000 = vmatmul.mubr.f32.vlgmr.msra.gmra.mrb[6].mxu1 %v1697_v8  ;;  %3066 = vmatmul.mubr.f32.vlgmr.msra.gmra.mrb[4].mxu0 %v1697_v8 }
 0x3b5   :  { %3206 = vmatpush3.bf16.msra.mxu1 %v3205_v52  ;;  %3242 = vmatpush3.bf16.msra.mxu0 %v3241_v53 }
 0x3b6   :  { %3207 = vmatprep.subr.bf16.mxu1 %v3538_v0  ;;  %3243 = vmatprep.subr.bf16.mxu0 %v3538_v0 }
 0x3b7   :  { %3010 = vmatprep.mubr.msk.f32.mxu1 %vm3539_vm0, %v3540_v1  ;;  %3076 = vmatprep.mubr.msk.f32.mxu0 %vm3539_vm0, %v3540_v1 }
 0x3b9   :  { %3209 = vmatpush3.bf16.msra.mxu1 %v3208_v54  ;;  %3245 = vmatpush3.bf16.msra.mxu0 %v3244_v55 }
 0x3ba   :  { %3210 = vmatprep.subr.bf16.mxu1 %v3538_v0  ;;  %3246 = vmatprep.subr.bf16.mxu0 %v3538_v0 }
 0x3bc   :  { %3011 = vmatmul.mubr.f32.vlgmr.msra.gmra.mrb[6].mxu1 %v3863_v6  ;;  %3077 = vmatmul.mubr.f32.vlgmr.msra.gmra.mrb[4].mxu0 %v3863_v6 }
 0x3bd   :  { %3212 = vmatpush3.bf16.msra.mxu1 %v3800_v62  ;;  %3248 = vmatpush3.bf16.msra.mxu0 %v3808_v4  ;;  %v2644_v62 = vld [vmem:[#allocation13] ss:$0 sm:$0xff]  ;;  %v2645_v4 = vld [vmem:[%s3955_s10] ss:$0 sm:$0xff] }
 0x3be   :  { %3213 = vmatprep.subr.bf16.mxu1 %v3538_v0  ;;  %3249 = vmatprep.subr.bf16.mxu0 %v3538_v0 }
 0x3bf   :  { %3021 = vmatprep.mubr.msk.f32.mxu1 %vm3539_vm0, %v3540_v1  ;;  %3087 = vmatprep.mubr.msk.f32.mxu0 %vm3539_vm0, %v3540_v1 }
 0x3c1   :  { %3215 = vmatpush3.bf16.msra.mxu1 %v3826_v18  ;;  %3251 = vmatpush3.bf16.msra.mxu0 %v3834_v22 }
 0x3c4   :  { %3022 = vmatmul.mubr.f32.vlgmr.msra.gmra.mrb[6].mxu1 %v3863_v6  ;;  %3088 = vmatmul.mubr.f32.vlgmr.msra.gmra.mrb[4].mxu0 %v3863_v6 }
 0x497   :  { %v2107_v0 = vpop.f32.mrb[6].mxu1  ;;  %v2604_v11 = vpop.f32.mrb[4].mxu0 }
 0x498   :  { %v3257_v1 = vadd.f32 %v2644_v62, %v2107_v0  ;;  %v3258_v12 = vadd.f32 %v2645_v4, %v2604_v11  ;;  %v3023_v13 = vpop.f32.mrb[7].mxu1  ;;  %v3089_v14 = vpop.f32.mrb[5].mxu0 }
 0x49a   :  { %2111 = vst [vmem:[#allocation14] sm:$0xff] %v3257_v1  ;;  %2608 = vst [vmem:[#allocation15] sm:$0xff] %v3258_v12 }
 0x49b   :  { %3484 = shalt.err (!%p3481_p4)
}
 0x49c   :  { %s3485_s25 = scalar_lea.hbm %s3956_s11, 128 }
 0x49d   :  { %p3486_p5 = scmp.ne.s32.totalorder %s3956_s11, %s3485_s25  ;;  %p3489_p6 = scmp.lt.u32.totalorder %s3485_s25, %s3956_s11 }
 0x49f   :  { %p3491_p7 = pnand %p3489_p6, %p3486_p5 }
 0x4a1   :  { %3494 = shalt.err (!%p3491_p7)
}
 0x4a2   :  { %2618 = dma.vmem_to_hbm [thread:$0]  %s2616_s14, 128, %s3956_s11, [#allocation4]  }
 0x4a3   :  { %s3495_s29 = scalar_lea.vmem %s2626_s24, 128  ;;  %p3500_p9 = scmp.lt.s32.totalorder %s2626_s24, %s2626_s24 }
 0x4a4   :  { %p3496_p8 = scmp.ne.s32.totalorder %s2626_s24, %s3495_s29  ;;  %p3501_p10 = scmp.lt.s32.totalorder %s3495_s29, %s3495_s29 }
 0x4a6   :  { %p3502_p11 = por %p3501_p10, %p3500_p9 }
 0x4a8   :  { %p3503_p12 = pnand %p3502_p11, %p3496_p8 }
 0x4aa   :  { %3506 = shalt.err (!%p3503_p12)
}
 0x4ab   :  { %s3507_s2 = scalar_lea.hbm %s3957_s12, 128 }
 0x4ac   :  { %p3508_p13 = scmp.ne.s32.totalorder %s3957_s12, %s3507_s2  ;;  %p3511_p0 = scmp.lt.u32.totalorder %s3507_s2, %s3957_s12 }
 0x4ae   :  { %p3513_p1 = pnand %p3511_p0, %p3508_p13 }
 0x4b0   :  { %3516 = shalt.err (!%p3513_p1)
}
 0x4b1   :  { %2628 = dma.vmem_to_hbm [thread:$0]  %s2626_s24, 128, %s3957_s12, [#allocation16]  }
 0x4b2   :  { %3525 = dma.done.wait [#allocation4], 128  }
 0x4b3   :  { %3526 = vsyncadd [#allocation4], 4294967168 }
 0x4b4   :  { %3527 = dma.done.wait [#allocation16], 128  }
 0x4b5   :  { %3528 = vsyncadd [#allocation16], 4294967168 }
 0x4b6   :  { %2635 = vsyncpa [#allocation3], 1 }
 0x4b7   :  { %2636 = vsyncpa [#allocation6], 1 }
 0x4b8   :  { %2637 = vsyncpa [#allocation9], 1 }
 0x4b9   :  { %2638 = vsyncpa [#allocation12], 1 }
 0x4ba   :  { %2639 = vsyncpa [#allocation4], 1 }
 0x4bb   :  { %2640 = vsyncpa [#allocation16], 1 }

</bundles_post_ra>
